<compile_context>
chip_gen: v6e
topology: v6e:2x2x1
jax: 0.10.0
libtpu: 0.0.40
codegen_flags: <defaults>
</compile_context>

<pallas_src>
import functools

import jax
import jax.numpy as jnp
from jax.experimental import pallas as pl
from jax.experimental.pallas import tpu as pltpu

LANE = 128
_UNROLL_MAX = 32  # window <= 32 -> unrolled shift-add; larger -> prefix sum


def _rsi_kernel(halo_ref, q_ref, out_ref, *, window: int):
    # halo_ref: (1, 1, 128)  -- the 128 padded prices preceding this block
    # q_ref:    (1, BR, 128) -- BR*128 consecutive padded prices (row-major);
    #                           flat element j of this block is price p[j+1]
    # out_ref:  (1, BR, 128) -- RSI value for every position of this block
    q = q_ref[0]                                              # (BR, 128)
    h = halo_ref[0]                                           # (1, 128)
    br = q.shape[0]

    # prev[r, :] = the 128 series elements immediately before row r.
    prev = jnp.concatenate([h, q[: br - 1, :]], axis=0)       # (BR, 128)
    ext = jnp.concatenate([prev, q], axis=1)                  # (BR, 256)

    # Backward price changes within each extended row:
    #   d[r, u] = ext[r, u + 1] - ext[r, u]
    d = ext[:, 1:] - ext[:, :-1]                              # (BR, 255)
    absd = jnp.abs(d)

    # Windowed sum of |d| over the trailing `window` diffs of each output
    # lane.  Output lane c sits at ext position c + 128; its window covers
    # d indices [c + 128 - window, c + 127].
    if window <= _UNROLL_MAX:
        # k-th term (k = 0..window-1) is the static 128-wide slice
        # [127 - k, 255 - k): cheap XLU lane shifts + VPU adds.
        s_abs = absd[:, 127:255]
        for k in range(1, window):
            s_abs = s_abs + absd[:, 127 - k : 255 - k]
    else:
        # log2 lane prefix sum of |d| (leading zero column so that
        # cs[:, v] = sum_{u < v} |d|[:, u]), then one slice + subtract.
        a = jnp.concatenate(
            [jnp.zeros((br, 1), jnp.float32), absd], axis=1)  # (BR, 256)
        lane = jax.lax.broadcasted_iota(jnp.int32, a.shape, 1)
        cs = a
        shift = 1
        while shift < 256:
            rolled = pltpu.roll(cs, shift, axis=1)
            cs = cs + jnp.where(lane >= shift, rolled, 0.0)
            shift *= 2
        s_abs = cs[:, 128:256] - cs[:, 128 - window : 256 - window]

    # Windowed sum of d telescopes:  sum_k d = ext[:, c+128] - ext[:, c+128-w]
    s_d = q - ext[:, 128 - window : 256 - window]

    # gains_sum = (S|d| + Sd)/2, losses_sum = (S|d| - Sd)/2, and
    # rsi = 100 - 100/(1 + rs) = 100*Sg / (S|d| + window*1e-10)
    #     = 50*(S|d| + Sd) / (S|d| + window*1e-10)
    num = 50.0 * (s_abs + s_d)
    den = s_abs + (window * 1e-10)
    out_ref[0] = num * pl.reciprocal(den, approx=True)


def rsi_pallas(prices: jax.Array, window_size: int, *, block_rows: int = 256) -> jax.Array:
    """prices: (N,) float -> rsi: (N-1,) float32."""
    n = prices.shape[0]
    m = n - 1
    if m < 1:
        raise ValueError("need at least two prices")
    if not (1 <= window_size <= LANE):
        raise ValueError("window_size must be in [1, 128]")

    p = prices.astype(jnp.float32)

    # Adapt the block size to the series length (short series -> one block),
    # keeping the sublane dim a multiple of 8.
    rows_needed = pl.cdiv(m, LANE)
    br = max(8, min(block_rows, ((rows_needed + 7) // 8) * 8))
    bsz = br * LANE
    g = pl.cdiv(m, bsz)
    total = g * bsz

    # Single padded copy of the series:  qp[127 + i] = p[i].
    #   Left edge-pad with p[0]  -> zero diffs there, i.e. exactly the left
    #   zero-padding of gains/losses that F.pad performs in the reference.
    #   Right edge-pad with p[-1] -> zero diffs in the discarded tail.
    # With this layout, output j lands at padded flat position 128 + j, so
    # the final extraction is a plain prefix slice of the kernel output.
    left = jnp.full((LANE - 1,), p[0], jnp.float32)
    right = jnp.full((total - m,), p[m], jnp.float32)
    qp = jnp.concatenate([left, p, right])                    # (128 + total,)

    main = qp[LANE:].reshape(g, br, LANE)                     # cur prices p[j+1]
    halo = qp[:total].reshape(g, bsz)[:, :LANE].reshape(g, 1, LANE)

    out = pl.pallas_call(
        functools.partial(_rsi_kernel, window=window_size),
        out_shape=jax.ShapeDtypeStruct((g, br, LANE), jnp.float32),
        grid=(g,),
        in_specs=[
            pl.BlockSpec((1, 1, LANE), lambda i: (i, 0, 0)),
            pl.BlockSpec((1, br, LANE), lambda i: (i, 0, 0)),
        ],
        out_specs=pl.BlockSpec((1, br, LANE), lambda i: (i, 0, 0)),
        compiler_params=pltpu.CompilerParams(
            dimension_semantics=("parallel",),
        ),
    )(halo, main)

    # Output j sits at flat position j; only the padded tail is dropped.
    return out.reshape(-1)[:m]


def _rsi_ref(prices: jax.Array, window_size: int) -> jax.Array:
    """Pure-JAX reference mirroring the PyTorch module."""
    diff = prices[1:] - prices[:-1]
    gains = jnp.maximum(diff, 0.0)
    losses = jnp.maximum(-diff, 0.0)
    gp = jnp.pad(gains, (window_size - 1, 0))
    lp = jnp.pad(losses, (window_size - 1, 0))
    kern = jnp.ones((window_size,), jnp.float32) / window_size
    avg_gain = jnp.convolve(gp, kern, mode="valid")
    avg_loss = jnp.convolve(lp, kern, mode="valid")
    rs = avg_gain / (avg_loss + 1e-10)
    return 100.0 - 100.0 / (1.0 + rs)


if __name__ == "__main__":
    N = 2500  # -> 2499 RSI values

    key = jax.random.PRNGKey(0)
    steps = jax.random.normal(key, (N,), dtype=jnp.float32)
    prices = 100.0 + jnp.cumsum(steps)  # synthetic random-walk price series

    ref14 = _rsi_ref(prices, 14)
    ref64 = _rsi_ref(prices, 64)

    # Default (large) block: single grid step here.
    out_a = jax.block_until_ready(rsi_pallas(prices, 14))
    # Forced small blocks: exercises the multi-block halo path.
    out_b = jax.block_until_ready(rsi_pallas(prices, 14, block_rows=8))
    # Large window: exercises the log2 prefix-sum accumulation path.
    out_c = jax.block_until_ready(rsi_pallas(prices, 64, block_rows=8))

    for out, ref in ((out_a, ref14), (out_b, ref14), (out_c, ref64)):
        assert out.shape == (N - 1,), out.shape
        max_err = jnp.max(jnp.abs(out - ref))
        assert jnp.allclose(out, ref, atol=5e-3, rtol=5e-3), f"max abs err = {max_err}"

    print("KERNEL_OK")
</pallas_src>

<mosaic_0001>
module attributes {stable_mosaic.version = 11 : i64} {
  func.func @_rsi_kernel(%arg0: i32, %arg1: memref<1x1x128xf32, #tpu.memory_space<vmem>>, %arg2: memref<1x24x128xf32, #tpu.memory_space<vmem>>, %arg3: memref<1x24x128xf32, #tpu.memory_space<vmem>>) attributes {dimension_semantics = [#tpu.dimension_semantics<parallel>], iteration_bounds = array<i64: 1>, scalar_prefetch = 0 : i64, scratch_operands = 0 : i64, tpu.core_type = #tpu.core_type<tc>, window_params = [{transform_indices = @transform_0, window_bounds = array<i64: 1, 1, 128>}, {transform_indices = @transform_1, window_bounds = array<i64: 1, 24, 128>}, {transform_indices = @transform_2, window_bounds = array<i64: 1, 24, 128>}]} {
    %c0 = arith.constant 0 : index
    %c0_0 = arith.constant 0 : index
    %c0_1 = arith.constant 0 : index
    %0 = vector.load %arg2[%c0, %c0_0, %c0_1] : memref<1x24x128xf32, #tpu.memory_space<vmem>>, vector<1x24x128xf32>
    %1 = vector.shape_cast %0 : vector<1x24x128xf32> to vector<24x128xf32>
    %c0_2 = arith.constant 0 : index
    %c0_3 = arith.constant 0 : index
    %c0_4 = arith.constant 0 : index
    %2 = vector.load %arg1[%c0_2, %c0_3, %c0_4] : memref<1x1x128xf32, #tpu.memory_space<vmem>>, vector<1x1x128xf32>
    %3 = vector.shape_cast %2 : vector<1x1x128xf32> to vector<1x128xf32>
    %4 = vector.extract_strided_slice %1 {offsets = [0, 0], sizes = [23, 128], strides = [1, 1]} : vector<24x128xf32> to vector<23x128xf32>
    %5 = tpu.concatenate %3, %4 in 0 : vector<1x128xf32>, vector<23x128xf32> -> vector<24x128xf32>
    %6 = tpu.concatenate %5, %1 in 1 : vector<24x128xf32>, vector<24x128xf32> -> vector<24x256xf32>
    %7 = vector.extract_strided_slice %6 {offsets = [0, 1], sizes = [24, 255], strides = [1, 1]} : vector<24x256xf32> to vector<24x255xf32>
    %8 = vector.extract_strided_slice %6 {offsets = [0, 0], sizes = [24, 255], strides = [1, 1]} : vector<24x256xf32> to vector<24x255xf32>
    %9 = arith.subf %7, %8 : vector<24x255xf32>
    %10 = math.absf %9 : vector<24x255xf32>
    %11 = vector.extract_strided_slice %10 {offsets = [0, 127], sizes = [24, 128], strides = [1, 1]} : vector<24x255xf32> to vector<24x128xf32>
    %12 = vector.extract_strided_slice %10 {offsets = [0, 126], sizes = [24, 128], strides = [1, 1]} : vector<24x255xf32> to vector<24x128xf32>
    %13 = arith.addf %11, %12 : vector<24x128xf32>
    %14 = vector.extract_strided_slice %10 {offsets = [0, 125], sizes = [24, 128], strides = [1, 1]} : vector<24x255xf32> to vector<24x128xf32>
    %15 = arith.addf %13, %14 : vector<24x128xf32>
    %16 = vector.extract_strided_slice %10 {offsets = [0, 124], sizes = [24, 128], strides = [1, 1]} : vector<24x255xf32> to vector<24x128xf32>
    %17 = arith.addf %15, %16 : vector<24x128xf32>
    %18 = vector.extract_strided_slice %10 {offsets = [0, 123], sizes = [24, 128], strides = [1, 1]} : vector<24x255xf32> to vector<24x128xf32>
    %19 = arith.addf %17, %18 : vector<24x128xf32>
    %20 = vector.extract_strided_slice %10 {offsets = [0, 122], sizes = [24, 128], strides = [1, 1]} : vector<24x255xf32> to vector<24x128xf32>
    %21 = arith.addf %19, %20 : vector<24x128xf32>
    %22 = vector.extract_strided_slice %10 {offsets = [0, 121], sizes = [24, 128], strides = [1, 1]} : vector<24x255xf32> to vector<24x128xf32>
    %23 = arith.addf %21, %22 : vector<24x128xf32>
    %24 = vector.extract_strided_slice %10 {offsets = [0, 120], sizes = [24, 128], strides = [1, 1]} : vector<24x255xf32> to vector<24x128xf32>
    %25 = arith.addf %23, %24 : vector<24x128xf32>
    %26 = vector.extract_strided_slice %10 {offsets = [0, 119], sizes = [24, 128], strides = [1, 1]} : vector<24x255xf32> to vector<24x128xf32>
    %27 = arith.addf %25, %26 : vector<24x128xf32>
    %28 = vector.extract_strided_slice %10 {offsets = [0, 118], sizes = [24, 128], strides = [1, 1]} : vector<24x255xf32> to vector<24x128xf32>
    %29 = arith.addf %27, %28 : vector<24x128xf32>
    %30 = vector.extract_strided_slice %10 {offsets = [0, 117], sizes = [24, 128], strides = [1, 1]} : vector<24x255xf32> to vector<24x128xf32>
    %31 = arith.addf %29, %30 : vector<24x128xf32>
    %32 = vector.extract_strided_slice %10 {offsets = [0, 116], sizes = [24, 128], strides = [1, 1]} : vector<24x255xf32> to vector<24x128xf32>
    %33 = arith.addf %31, %32 : vector<24x128xf32>
    %34 = vector.extract_strided_slice %10 {offsets = [0, 115], sizes = [24, 128], strides = [1, 1]} : vector<24x255xf32> to vector<24x128xf32>
    %35 = arith.addf %33, %34 : vector<24x128xf32>
    %36 = vector.extract_strided_slice %10 {offsets = [0, 114], sizes = [24, 128], strides = [1, 1]} : vector<24x255xf32> to vector<24x128xf32>
    %37 = arith.addf %35, %36 : vector<24x128xf32>
    %38 = vector.extract_strided_slice %6 {offsets = [0, 114], sizes = [24, 128], strides = [1, 1]} : vector<24x256xf32> to vector<24x128xf32>
    %39 = arith.subf %1, %38 : vector<24x128xf32>
    %40 = arith.addf %37, %39 : vector<24x128xf32>
    %cst = arith.constant 5.000000e+01 : f32
    %41 = vector.broadcast %cst : f32 to vector<24x128xf32>
    %42 = arith.mulf %41, %40 : vector<24x128xf32>
    %cst_5 = arith.constant 1.400000e-09 : f32
    %43 = vector.broadcast %cst_5 : f32 to vector<24x128xf32>
    %44 = arith.addf %37, %43 : vector<24x128xf32>
    %45 = tpu.reciprocal %44 {approx = true} : vector<24x128xf32> -> vector<24x128xf32>
    %46 = arith.mulf %42, %45 : vector<24x128xf32>
    %c0_6 = arith.constant 0 : index
    %c0_7 = arith.constant 0 : index
    %c0_8 = arith.constant 0 : index
    %47 = vector.load %arg3[%c0_6, %c0_7, %c0_8] : memref<1x24x128xf32, #tpu.memory_space<vmem>>, vector<1x24x128xf32>
    %48 = vector.shape_cast %47 : vector<1x24x128xf32> to vector<24x128xf32>
    %49 = vector.shape_cast %46 : vector<24x128xf32> to vector<1x24x128xf32>
    tpu.vector_store %arg3[%c0_6, %c0_7, %c0_8], %49 {strides = array<i32>} : memref<1x24x128xf32, #tpu.memory_space<vmem>>, vector<1x24x128xf32>,
    return
  }
  func.func @transform_0(%arg0: i32) -> (i32, i32, i32) {
    %c0_i32 = arith.constant 0 : i32
    %c0_i32_0 = arith.constant 0 : i32
    %c0_i32_1 = arith.constant 0 : i32
    return %arg0, %c0_i32, %c0_i32_0 : i32, i32, i32
  }
  func.func @transform_1(%arg0: i32) -> (i32, i32, i32) {
    %c0_i32 = arith.constant 0 : i32
    %c0_i32_0 = arith.constant 0 : i32
    %c0_i32_1 = arith.constant 0 : i32
    return %arg0, %c0_i32, %c0_i32_0 : i32, i32, i32
  }
  func.func @transform_2(%arg0: i32) -> (i32, i32, i32) {
    %c0_i32 = arith.constant 0 : i32
    %c0_i32_0 = arith.constant 0 : i32
    %c0_i32_1 = arith.constant 0 : i32
    return %arg0, %c0_i32, %c0_i32_0 : i32, i32, i32
  }
}

</mosaic_0001>

<bundles_post_ra>
// kernel: tpu_custom_call.1
= control target key start
LH: loop header
LB: loop body
LE: loop exit
PB: predicated region body
PF: predicated region fallthrough
CT: control target
= control target key end

     0   :  { %7 = vsyncpa [#allocation3], 0  ;;  %s763_s0 = inlined_call_operand.hbm [shape: f32[1,1,128], index: 0, kind: input, shape index: {}]   ;;  %s764_s1 = inlined_call_operand.hbm [shape: f32[1,24,128], index: 1, kind: input, shape index: {}]   ;;  %s765_s2 = inlined_call_operand.hbm [shape: f32[1,24,128], index: 2, kind: output, shape index: {}]  }
   0x1   :  { %8 = vsyncpa [#allocation6], 0 }
   0x2   :  { %9 = vsyncpa [#allocation4], 0  ;;  %s529_s9 = smov [#allocation2]   ;;  %s530_s11 = smov [#allocation5]  }
   0x3   :  { %s16_s10 = sshll.u32 %s529_s9, 4  ;;  %s25_s12 = sshll.u32 %s530_s11, 4  ;;  %s17_s10 = int_to_ptr.vmem [resolvable:$true] %s16_s10  ;;  %s26_s12 = int_to_ptr.vmem [resolvable:$true] %s25_s12 }
   0x4   :  { %s471_s13 = scalar_lea.vmem %s17_s10, 16  ;;  %s475_s14 = scalar_lea.vmem %s17_s10, 32 }
   0x5   :  { %p472_p0 = scmp.ne.s32.totalorder %s17_s10, %s471_s13  ;;  %p476_p1 = scmp.lt.s32.totalorder %s17_s10, %s17_s10 }
   0x6   :  { %p477_p2 = scmp.lt.s32.totalorder %s475_s14, %s471_s13 }
   0x8   :  { %p478_p3 = por %p477_p2, %p476_p1 }
   0xa   :  { %p479_p4 = pnand %p478_p3, %p472_p0 }
   0xc   :  { %482 = shalt.err (!%p479_p4)
}
   0xd   :  { %19 = dma.hbm_to_vmem [thread:$0]  %s763_s0, 16, %s17_s10, [#allocation3]  }
   0xe   :  { %s491_s17 = scalar_lea.vmem %s26_s12, 384  ;;  %p496_p6 = scmp.lt.s32.totalorder %s26_s12, %s26_s12 }
   0xf   :  { %p492_p5 = scmp.ne.s32.totalorder %s26_s12, %s491_s17  ;;  %p497_p7 = scmp.lt.s32.totalorder %s491_s17, %s491_s17 }
  0x11   :  { %p498_p8 = por %p497_p7, %p496_p6 }
  0x13   :  { %p499_p9 = pnand %p498_p8, %p492_p5 }
  0x15   :  { %502 = shalt.err (!%p499_p9)
}
  0x16   :  { %s531_s18 = smov 128   ;;  %s532_s19 = smov 8  }
  0x17   :  { %31 = dma.hbm_to_vmem [thread:$0]  %s764_s1, 384, %s26_s12, [#allocation6], %s531_s18, %s531_s18, %s532_s19  }
  0x18   :  { %523 = dma.done.wait [#allocation3], 16  }
  0x19   :  { %524 = vsyncadd [#allocation3], 4294967280 }
  0x1a   :  { %525 = dma.done.wait [#allocation6], 384  }
  0x1b   :  { %526 = vsyncadd [#allocation6], 4294966912  ;;  %v571_v0 = vld [vmem:[#allocation5 + $0x8] sm:$0xff]  ;;  %v573_v1 = vld [vmem:[#allocation5] sm:$0xff]  ;;  %vm45_vm0 = vcmask 1040384   ;;  %s533_s0 = smov 1  }
  0x1c   :  { %v575_v2 = vld [vmem:[#allocation5 + $0x10] sm:$0xff]  ;;  %62 = vrot.lane.b32.xlu1 %v571_v0, %s533_s0  ;;  %58 = vrot.lane.b32.xlu0 %v573_v1, %s533_s0  ;;  %v41_v3 = vld [vmem:[#allocation2] sm:$0x1]  ;;  %v46_v4 = vrot.slane %v573_v1, 7  ;;  %v47_v5 = vrot.slane %v571_v0, 7  ;;  %vm68_vm1 = vcmask 7168  }
  0x1d   :  { %v49_v6 = vrot.slane %v575_v2, 7  ;;  %s534_s1 = smov 2   ;;  %s535_s22 = smov 3   ;;  %vm129_vm2 = vcmask 15360   ;;  %vm151_vm3 = vcmask 23552   ;;  %vm173_vm4 = vcmask 31744  }
  0x1e   :  { %v584_v7 = vsel %vm45_vm0, %v41_v3, %v46_v4  ;;  %v592_v9 = vsel %vm45_vm0, %v46_v4, %v47_v5  ;;  %s536_s23 = smov 4   ;;  %s537_s24 = smov 5   ;;  %vm195_vm5 = vcmask 39936   ;;  %vm217_vm6 = vcmask 48128  }
  0x1f   :  { %v590_v8 = vsel %vm45_vm0, %v47_v5, %v49_v6  ;;  %s538_s25 = smov 6   ;;  %s539_s26 = smov 7   ;;  %vm239_vm7 = vcmask 56320   ;;  %vm261_vm8 = vcmask 64512   ;;  %vm283_vm9 = vcmask 72704  }
  0x20   :  { %66 = vrot.lane.b32.xlu1 %v575_v2, %s533_s0  ;;  %56 = vrot.lane.b32.xlu0 %v584_v7, %s533_s0  ;;  %s540_s27 = smov 9   ;;  %s541_s28 = smov 10   ;;  %vm305_vm10 = vcmask 80896   ;;  %vm327_vm11 = vcmask 89088   ;;  %vm349_vm12 = vcmask 97280   ;;  %vm371_vm13 = vcmask 105472  }
  0x21   :  { %s542_s29 = smov 11   ;;  %s543_s30 = smov 12   ;;  %vm393_vm14 = vcmask 113664  }
  0x22   :  { %s544_s3 = smov 13   ;;  %s545_s4 = smov 14  }
  0x23   :  { %s546_s5 = smov [#allocation7]  }
  0x24   :  { %64 = vrot.lane.b32.xlu0 %v590_v8, %s533_s0  ;;  %60 = vrot.lane.b32.xlu1 %v592_v9, %s533_s0  ;;  %s426_s6 = sshll.u32 %s546_s5, 4  ;;  %s427_s6 = int_to_ptr.vmem [resolvable:$true] %s426_s6 }
  0x25   :  { %s503_s7 = scalar_lea.vmem %s427_s6, 384  ;;  %p508_p11 = scmp.lt.s32.totalorder %s427_s6, %s427_s6 }
  0x26   :  { %p504_p10 = scmp.ne.s32.totalorder %s427_s6, %s503_s7  ;;  %p509_p12 = scmp.lt.s32.totalorder %s503_s7, %s503_s7 }
  0x28   :  { %p510_p13 = por %p509_p12, %p508_p11 }
  0x2a   :  { %p511_p0 = pnand %p510_p13, %p504_p10 }
  0x8e   :  { %v63_v10 = vpop.permute.xlu1 %62  ;;  %v59_v11 = vpop.permute.xlu0 %58 }
  0x92   :  { %v67_v12 = vpop.permute.xlu1 %66  ;;  %v57_v13 = vpop.permute.xlu0 %56 }
  0x93   :  { %v69_v14 = vsel %vm68_vm1, %v57_v13, %v59_v11  ;;  %v78_v15 = vsub.f32 %v584_v7, %v57_v13 }
  0x94   :  { %v79_v16 = vsub.f32 %v573_v1, %v69_v14 }
  0x95   :  { %v601_v17 = vand.u32 2147483647, %v78_v15 }
  0x96   :  { %v603_v18 = vand.u32 2147483647, %v79_v16  ;;  %v65_v19 = vpop.permute.xlu0 %64  ;;  %v61_v20 = vpop.permute.xlu1 %60 }
  0x97   :  { %v71_v21 = vsel %vm68_vm1, %v65_v19, %v67_v12  ;;  %v82_v22 = vsub.f32 %v590_v8, %v65_v19  ;;  %v70_v23 = vsel %vm68_vm1, %v61_v20, %v63_v10  ;;  %v80_v24 = vsub.f32 %v592_v9, %v61_v20  ;;  %96 = vrot.lane.b32.xlu0 %v601_v17, %s533_s0 }
  0x98   :  { %v81_v25 = vsub.f32 %v571_v0, %v70_v23  ;;  %98 = vrot.lane.b32.xlu1 %v603_v18, %s533_s0  ;;  %v83_v27 = vsub.f32 %v575_v2, %v71_v21 }
  0x99   :  { %v614_v26 = vand.u32 2147483647, %v80_v24  ;;  %v619_v29 = vand.u32 2147483647, %v82_v22 }
  0x9a   :  { %v617_v28 = vand.u32 2147483647, %v81_v25  ;;  %v625_v30 = vand.u32 2147483647, %v83_v27 }
  0x9b   :  { %100 = vrot.lane.b32.xlu0 %v614_v26, %s533_s0 }
  0x9c   :  { %102 = vrot.lane.b32.xlu1 %v617_v28, %s533_s0 }
  0x9f   :  { %104 = vrot.lane.b32.xlu0 %v619_v29, %s533_s0 }
  0xa0   :  { %106 = vrot.lane.b32.xlu1 %v625_v30, %s533_s0 }
  0xa3   :  { %117 = vrot.lane.b32.xlu0 %v601_v17, %s534_s1 }
  0xa4   :  { %119 = vrot.lane.b32.xlu1 %v603_v18, %s534_s1 }
  0xa7   :  { %121 = vrot.lane.b32.xlu0 %v614_v26, %s534_s1 }
  0xa8   :  { %123 = vrot.lane.b32.xlu1 %v617_v28, %s534_s1 }
  0xab   :  { %125 = vrot.lane.b32.xlu0 %v619_v29, %s534_s1 }
  0xac   :  { %127 = vrot.lane.b32.xlu1 %v625_v30, %s534_s1 }
  0xaf   :  { %139 = vrot.lane.b32.xlu0 %v601_v17, %s535_s22 }
  0xb0   :  { %141 = vrot.lane.b32.xlu1 %v603_v18, %s535_s22 }
  0xb3   :  { %143 = vrot.lane.b32.xlu0 %v614_v26, %s535_s22 }
  0xb4   :  { %145 = vrot.lane.b32.xlu1 %v617_v28, %s535_s22 }
  0xb7   :  { %147 = vrot.lane.b32.xlu0 %v619_v29, %s535_s22 }
  0xb8   :  { %149 = vrot.lane.b32.xlu1 %v625_v30, %s535_s22 }
  0xbb   :  { %161 = vrot.lane.b32.xlu0 %v601_v17, %s536_s23 }
  0xbc   :  { %163 = vrot.lane.b32.xlu1 %v603_v18, %s536_s23 }
  0xbf   :  { %165 = vrot.lane.b32.xlu0 %v614_v26, %s536_s23 }
  0xc0   :  { %167 = vrot.lane.b32.xlu1 %v617_v28, %s536_s23 }
  0xc3   :  { %169 = vrot.lane.b32.xlu0 %v619_v29, %s536_s23 }
  0xc4   :  { %171 = vrot.lane.b32.xlu1 %v625_v30, %s536_s23 }
  0xc7   :  { %183 = vrot.lane.b32.xlu0 %v601_v17, %s537_s24 }
  0xc8   :  { %185 = vrot.lane.b32.xlu1 %v603_v18, %s537_s24 }
  0xcb   :  { %187 = vrot.lane.b32.xlu0 %v614_v26, %s537_s24 }
  0xcc   :  { %189 = vrot.lane.b32.xlu1 %v617_v28, %s537_s24 }
  0xcf   :  { %191 = vrot.lane.b32.xlu0 %v619_v29, %s537_s24 }
  0xd0   :  { %193 = vrot.lane.b32.xlu1 %v625_v30, %s537_s24 }
  0xd3   :  { %205 = vrot.lane.b32.xlu0 %v601_v17, %s538_s25 }
  0xd4   :  { %207 = vrot.lane.b32.xlu1 %v603_v18, %s538_s25 }
  0xd7   :  { %209 = vrot.lane.b32.xlu0 %v614_v26, %s538_s25 }
  0xd8   :  { %211 = vrot.lane.b32.xlu1 %v617_v28, %s538_s25 }
  0xdb   :  { %213 = vrot.lane.b32.xlu0 %v619_v29, %s538_s25 }
  0xdc   :  { %215 = vrot.lane.b32.xlu1 %v625_v30, %s538_s25 }
  0xdf   :  { %227 = vrot.lane.b32.xlu0 %v601_v17, %s539_s26 }
  0xe0   :  { %229 = vrot.lane.b32.xlu1 %v603_v18, %s539_s26 }
  0xe3   :  { %231 = vrot.lane.b32.xlu0 %v614_v26, %s539_s26 }
  0xe4   :  { %233 = vrot.lane.b32.xlu1 %v617_v28, %s539_s26 }
  0xe7   :  { %235 = vrot.lane.b32.xlu0 %v619_v29, %s539_s26 }
  0xe8   :  { %237 = vrot.lane.b32.xlu1 %v625_v30, %s539_s26 }
  0xeb   :  { %249 = vrot.lane.b32.xlu0 %v601_v17, %s532_s19 }
  0xec   :  { %251 = vrot.lane.b32.xlu1 %v603_v18, %s532_s19 }
  0xef   :  { %253 = vrot.lane.b32.xlu0 %v614_v26, %s532_s19 }
  0xf0   :  { %255 = vrot.lane.b32.xlu1 %v617_v28, %s532_s19 }
  0xf3   :  { %257 = vrot.lane.b32.xlu0 %v619_v29, %s532_s19 }
  0xf4   :  { %259 = vrot.lane.b32.xlu1 %v625_v30, %s532_s19 }
  0xf7   :  { %271 = vrot.lane.b32.xlu0 %v601_v17, %s540_s27 }
  0xf8   :  { %273 = vrot.lane.b32.xlu1 %v603_v18, %s540_s27 }
  0xfb   :  { %275 = vrot.lane.b32.xlu0 %v614_v26, %s540_s27 }
  0xfc   :  { %277 = vrot.lane.b32.xlu1 %v617_v28, %s540_s27 }
  0xff   :  { %279 = vrot.lane.b32.xlu0 %v619_v29, %s540_s27 }
 0x100   :  { %281 = vrot.lane.b32.xlu1 %v625_v30, %s540_s27 }
 0x103   :  { %293 = vrot.lane.b32.xlu0 %v601_v17, %s541_s28 }
 0x104   :  { %295 = vrot.lane.b32.xlu1 %v603_v18, %s541_s28 }
 0x107   :  { %297 = vrot.lane.b32.xlu0 %v614_v26, %s541_s28 }
 0x108   :  { %299 = vrot.lane.b32.xlu1 %v617_v28, %s541_s28 }
 0x109   :  { %v97_v31 = vpop.permute.xlu0 %96 }
 0x10a   :  { %v99_v32 = vpop.permute.xlu1 %98 }
 0x10b   :  { %v108_v33 = vsel %vm68_vm1, %v97_v31, %v99_v32  ;;  %301 = vrot.lane.b32.xlu0 %v619_v29, %s541_s28 }
 0x10c   :  { %303 = vrot.lane.b32.xlu1 %v625_v30, %s541_s28  ;;  %v114_v41 = vadd.f32 %v108_v33, %v603_v18 }
 0x10d   :  { %v101_v34 = vpop.permute.xlu0 %100 }
 0x10e   :  { %v103_v35 = vpop.permute.xlu1 %102 }
 0x10f   :  { %v109_v36 = vsel %vm68_vm1, %v101_v34, %v103_v35  ;;  %315 = vrot.lane.b32.xlu0 %v601_v17, %s542_s29 }
 0x110   :  { %317 = vrot.lane.b32.xlu1 %v603_v18, %s542_s29  ;;  %v115_v46 = vadd.f32 %v109_v36, %v617_v28 }
 0x111   :  { %v105_v37 = vpop.permute.xlu0 %104 }
 0x112   :  { %v107_v38 = vpop.permute.xlu1 %106 }
 0x113   :  { %v110_v39 = vsel %vm68_vm1, %v105_v37, %v107_v38  ;;  %319 = vrot.lane.b32.xlu0 %v614_v26, %s542_s29 }
 0x114   :  { %321 = vrot.lane.b32.xlu1 %v617_v28, %s542_s29  ;;  %v116_v51 = vadd.f32 %v110_v39, %v625_v30 }
 0x115   :  { %v118_v40 = vpop.permute.xlu0 %117 }
 0x116   :  { %v120_v42 = vpop.permute.xlu1 %119 }
 0x117   :  { %v130_v43 = vsel %vm129_vm2, %v118_v40, %v120_v42  ;;  %323 = vrot.lane.b32.xlu0 %v619_v29, %s542_s29 }
 0x118   :  { %v136_v44 = vadd.f32 %v130_v43, %v114_v41  ;;  %325 = vrot.lane.b32.xlu1 %v625_v30, %s542_s29 }
 0x119   :  { %v122_v45 = vpop.permute.xlu0 %121 }
 0x11a   :  { %v124_v47 = vpop.permute.xlu1 %123 }
 0x11b   :  { %v131_v48 = vsel %vm129_vm2, %v122_v45, %v124_v47  ;;  %337 = vrot.lane.b32.xlu0 %v601_v17, %s543_s30 }
 0x11c   :  { %v137_v49 = vadd.f32 %v131_v48, %v115_v46  ;;  %339 = vrot.lane.b32.xlu1 %v603_v18, %s543_s30 }
 0x11d   :  { %v126_v50 = vpop.permute.xlu0 %125 }
 0x11e   :  { %v128_v52 = vpop.permute.xlu1 %127 }
 0x11f   :  { %v132_v53 = vsel %vm129_vm2, %v126_v50, %v128_v52  ;;  %341 = vrot.lane.b32.xlu0 %v614_v26, %s543_s30 }
 0x120   :  { %v138_v54 = vadd.f32 %v132_v53, %v116_v51  ;;  %343 = vrot.lane.b32.xlu1 %v617_v28, %s543_s30 }
 0x121   :  { %v140_v55 = vpop.permute.xlu0 %139 }
 0x122   :  { %v142_v56 = vpop.permute.xlu1 %141 }
 0x123   :  { %v152_v57 = vsel %vm151_vm3, %v140_v55, %v142_v56  ;;  %345 = vrot.lane.b32.xlu0 %v619_v29, %s543_s30 }
 0x124   :  { %v158_v58 = vadd.f32 %v152_v57, %v136_v44  ;;  %347 = vrot.lane.b32.xlu1 %v625_v30, %s543_s30 }
 0x125   :  { %v144_v59 = vpop.permute.xlu0 %143 }
 0x126   :  { %v146_v60 = vpop.permute.xlu1 %145 }
 0x127   :  { %v153_v61 = vsel %vm151_vm3, %v144_v59, %v146_v60  ;;  %359 = vrot.lane.b32.xlu0 %v601_v17, %s544_s3 }
 0x128   :  { %v159_v62 = vadd.f32 %v153_v61, %v137_v49  ;;  %361 = vrot.lane.b32.xlu1 %v603_v18, %s544_s3 }
 0x129   :  { %v148_v63 = vpop.permute.xlu0 %147 }
 0x12a   :  { %v150_v3 = vpop.permute.xlu1 %149 }
 0x12b   :  { %v154_v4 = vsel %vm151_vm3, %v148_v63, %v150_v3  ;;  %363 = vrot.lane.b32.xlu0 %v614_v26, %s544_s3 }
 0x12c   :  { %v160_v5 = vadd.f32 %v154_v4, %v138_v54  ;;  %365 = vrot.lane.b32.xlu1 %v617_v28, %s544_s3 }
 0x12d   :  { %v162_v6 = vpop.permute.xlu0 %161 }
 0x12e   :  { %v164_v10 = vpop.permute.xlu1 %163 }
 0x12f   :  { %v174_v11 = vsel %vm173_vm4, %v162_v6, %v164_v10  ;;  %367 = vrot.lane.b32.xlu0 %v619_v29, %s544_s3 }
 0x130   :  { %v180_v12 = vadd.f32 %v174_v11, %v158_v58  ;;  %369 = vrot.lane.b32.xlu1 %v625_v30, %s544_s3 }
 0x131   :  { %v166_v13 = vpop.permute.xlu0 %165 }
 0x132   :  { %v168_v14 = vpop.permute.xlu1 %167 }
 0x133   :  { %v175_v15 = vsel %vm173_vm4, %v166_v13, %v168_v14  ;;  %381 = vrot.lane.b32.xlu0 %v584_v7, %s545_s4 }
 0x134   :  { %v181_v16 = vadd.f32 %v175_v15, %v159_v62  ;;  %383 = vrot.lane.b32.xlu1 %v573_v1, %s545_s4 }
 0x135   :  { %v170_v17 = vpop.permute.xlu0 %169 }
 0x136   :  { %v172_v18 = vpop.permute.xlu1 %171 }
 0x137   :  { %v176_v19 = vsel %vm173_vm4, %v170_v17, %v172_v18  ;;  %385 = vrot.lane.b32.xlu0 %v592_v9, %s545_s4 }
 0x138   :  { %v182_v20 = vadd.f32 %v176_v19, %v160_v5  ;;  %387 = vrot.lane.b32.xlu1 %v571_v0, %s545_s4 }
 0x139   :  { %v184_v21 = vpop.permute.xlu0 %183 }
 0x13a   :  { %v186_v22 = vpop.permute.xlu1 %185 }
 0x13b   :  { %v196_v23 = vsel %vm195_vm5, %v184_v21, %v186_v22  ;;  %389 = vrot.lane.b32.xlu0 %v590_v8, %s545_s4 }
 0x13c   :  { %v202_v24 = vadd.f32 %v196_v23, %v180_v12  ;;  %391 = vrot.lane.b32.xlu1 %v575_v2, %s545_s4 }
 0x13d   :  { %v188_v7 = vpop.permute.xlu0 %187 }
 0x13e   :  { %v190_v25 = vpop.permute.xlu1 %189 }
 0x13f   :  { %v197_v26 = vsel %vm195_vm5, %v188_v7, %v190_v25 }
 0x140   :  { %v203_v27 = vadd.f32 %v197_v26, %v181_v16 }
 0x141   :  { %v192_v28 = vpop.permute.xlu0 %191 }
 0x142   :  { %v194_v29 = vpop.permute.xlu1 %193 }
 0x143   :  { %v198_v30 = vsel %vm195_vm5, %v192_v28, %v194_v29 }
 0x144   :  { %v204_v9 = vadd.f32 %v198_v30, %v182_v20 }
 0x145   :  { %v206_v31 = vpop.permute.xlu0 %205 }
 0x146   :  { %v208_v32 = vpop.permute.xlu1 %207 }
 0x147   :  { %v218_v33 = vsel %vm217_vm6, %v206_v31, %v208_v32 }
 0x148   :  { %v224_v34 = vadd.f32 %v218_v33, %v202_v24 }
 0x149   :  { %v210_v35 = vpop.permute.xlu0 %209 }
 0x14a   :  { %v212_v36 = vpop.permute.xlu1 %211 }
 0x14b   :  { %v219_v37 = vsel %vm217_vm6, %v210_v35, %v212_v36 }
 0x14c   :  { %v225_v8 = vadd.f32 %v219_v37, %v203_v27 }
 0x14d   :  { %v214_v38 = vpop.permute.xlu0 %213 }
 0x14e   :  { %v216_v39 = vpop.permute.xlu1 %215 }
 0x14f   :  { %v220_v40 = vsel %vm217_vm6, %v214_v38, %v216_v39 }
 0x150   :  { %v226_v41 = vadd.f32 %v220_v40, %v204_v9 }
 0x151   :  { %v228_v42 = vpop.permute.xlu0 %227 }
 0x152   :  { %v230_v43 = vpop.permute.xlu1 %229 }
 0x153   :  { %v240_v14 = vsel %vm239_vm7, %v228_v42, %v230_v43 }
 0x154   :  { %v246_v18 = vadd.f32 %v240_v14, %v224_v34 }
 0x155   :  { %v232_v44 = vpop.permute.xlu0 %231 }
 0x156   :  { %v234_v45 = vpop.permute.xlu1 %233 }
 0x157   :  { %v241_v19 = vsel %vm239_vm7, %v232_v44, %v234_v45 }
 0x158   :  { %v247_v25 = vadd.f32 %v241_v19, %v225_v8 }
 0x159   :  { %v236_v46 = vpop.permute.xlu0 %235 }
 0x15a   :  { %v238_v47 = vpop.permute.xlu1 %237 }
 0x15b   :  { %v242_v27 = vsel %vm239_vm7, %v236_v46, %v238_v47 }
 0x15c   :  { %v248_v36 = vadd.f32 %v242_v27, %v226_v41 }
 0x15d   :  { %v250_v48 = vpop.permute.xlu0 %249 }
 0x15e   :  { %v252_v49 = vpop.permute.xlu1 %251 }
 0x15f   :  { %v262_v17 = vsel %vm261_vm8, %v250_v48, %v252_v49 }
 0x160   :  { %v268_v22 = vadd.f32 %v262_v17, %v246_v18 }
 0x161   :  { %v254_v50 = vpop.permute.xlu0 %253 }
 0x162   :  { %v256_v51 = vpop.permute.xlu1 %255 }
 0x163   :  { %v263_v24 = vsel %vm261_vm8, %v254_v50, %v256_v51 }
 0x164   :  { %v269_v9 = vadd.f32 %v263_v24, %v247_v25 }
 0x165   :  { %v258_v52 = vpop.permute.xlu0 %257 }
 0x166   :  { %v260_v53 = vpop.permute.xlu1 %259 }
 0x167   :  { %v264_v33 = vsel %vm261_vm8, %v258_v52, %v260_v53 }
 0x168   :  { %v270_v42 = vadd.f32 %v264_v33, %v248_v36 }
 0x169   :  { %v272_v54 = vpop.permute.xlu0 %271 }
 0x16a   :  { %v274_v55 = vpop.permute.xlu1 %273 }
 0x16b   :  { %v284_v20 = vsel %vm283_vm9, %v272_v54, %v274_v55 }
 0x16c   :  { %v290_v26 = vadd.f32 %v284_v20, %v268_v22 }
 0x16d   :  { %v276_v56 = vpop.permute.xlu0 %275 }
 0x16e   :  { %v278_v57 = vpop.permute.xlu1 %277 }
 0x16f   :  { %v285_v28 = vsel %vm283_vm9, %v276_v56, %v278_v57 }
 0x170   :  { %v291_v37 = vadd.f32 %v285_v28, %v269_v9 }
 0x171   :  { %v280_v58 = vpop.permute.xlu0 %279 }
 0x172   :  { %v282_v59 = vpop.permute.xlu1 %281 }
 0x173   :  { %v286_v38 = vsel %vm283_vm9, %v280_v58, %v282_v59 }
 0x174   :  { %v292_v49 = vadd.f32 %v286_v38, %v270_v42 }
 0x175   :  { %v294_v60 = vpop.permute.xlu0 %293 }
 0x176   :  { %v296_v61 = vpop.permute.xlu1 %295 }
 0x177   :  { %v306_v7 = vsel %vm305_vm10, %v294_v60, %v296_v61 }
 0x178   :  { %v312_v31 = vadd.f32 %v306_v7, %v290_v26 }
 0x179   :  { %v298_v62 = vpop.permute.xlu0 %297 }
 0x17a   :  { %v300_v63 = vpop.permute.xlu1 %299 }
 0x17b   :  { %v307_v34 = vsel %vm305_vm10, %v298_v62, %v300_v63 }
 0x17c   :  { %v313_v43 = vadd.f32 %v307_v34, %v291_v37 }
 0x17d   :  { %v302_v3 = vpop.permute.xlu0 %301 }
 0x17e   :  { %v304_v4 = vpop.permute.xlu1 %303 }
 0x17f   :  { %v308_v46 = vsel %vm305_vm10, %v302_v3, %v304_v4 }
 0x180   :  { %v314_v53 = vadd.f32 %v308_v46, %v292_v49 }
 0x181   :  { %v316_v5 = vpop.permute.xlu0 %315 }
 0x182   :  { %v318_v6 = vpop.permute.xlu1 %317 }
 0x183   :  { %v328_v29 = vsel %vm327_vm11, %v316_v5, %v318_v6 }
 0x184   :  { %v334_v8 = vadd.f32 %v328_v29, %v312_v31 }
 0x185   :  { %v320_v10 = vpop.permute.xlu0 %319 }
 0x186   :  { %v322_v11 = vpop.permute.xlu1 %321 }
 0x187   :  { %v329_v39 = vsel %vm327_vm11, %v320_v10, %v322_v11 }
 0x188   :  { %v335_v41 = vadd.f32 %v329_v39, %v313_v43 }
 0x189   :  { %v324_v12 = vpop.permute.xlu0 %323 }
 0x18a   :  { %v326_v13 = vpop.permute.xlu1 %325 }
 0x18b   :  { %v330_v51 = vsel %vm327_vm11, %v324_v12, %v326_v13 }
 0x18c   :  { %v336_v59 = vadd.f32 %v330_v51, %v314_v53 }
 0x18d   :  { %v338_v15 = vpop.permute.xlu0 %337 }
 0x18e   :  { %v340_v16 = vpop.permute.xlu1 %339 }
 0x18f   :  { %v350_v35 = vsel %vm349_vm12, %v338_v15, %v340_v16 }
 0x190   :  { %v356_v44 = vadd.f32 %v350_v35, %v334_v8 }
 0x191   :  { %v342_v21 = vpop.permute.xlu0 %341 }
 0x192   :  { %v344_v23 = vpop.permute.xlu1 %343 }
 0x193   :  { %v351_v47 = vsel %vm349_vm12, %v342_v21, %v344_v23 }
 0x194   :  { %v357_v54 = vadd.f32 %v351_v47, %v335_v41 }
 0x195   :  { %v346_v30 = vpop.permute.xlu0 %345 }
 0x196   :  { %v348_v32 = vpop.permute.xlu1 %347 }
 0x197   :  { %v352_v57 = vsel %vm349_vm12, %v346_v30, %v348_v32 }
 0x198   :  { %v358_v62 = vadd.f32 %v352_v57, %v336_v59 }
 0x199   :  { %v360_v40 = vpop.permute.xlu0 %359 }
 0x19a   :  { %v362_v45 = vpop.permute.xlu1 %361 }
 0x19b   :  { %v372_v48 = vsel %vm371_vm13, %v360_v40, %v362_v45 }
 0x19c   :  { %v378_v50 = vadd.f32 %v372_v48, %v356_v44 }
 0x19d   :  { %v364_v52 = vpop.permute.xlu0 %363 }
 0x19e   :  { %v409_v55 = vadd.f32 1.4e-09, %v378_v50  ;;  %v366_v56 = vpop.permute.xlu1 %365 }
 0x19f   :  { %v373_v58 = vsel %vm371_vm13, %v364_v52, %v366_v56 }
 0x1a0   :  { %457 = vrcp.f32 %v409_v55  ;;  %v379_v60 = vadd.f32 %v373_v58, %v357_v54 }
 0x1a1   :  { %v368_v61 = vpop.permute.xlu0 %367 }
 0x1a2   :  { %v410_v63 = vadd.f32 1.4e-09, %v379_v60  ;;  %v370_v3 = vpop.permute.xlu1 %369 }
 0x1a3   :  { %v374_v4 = vsel %vm371_vm13, %v368_v61, %v370_v3 }
 0x1a4   :  { %459 = vrcp.f32 %v410_v63  ;;  %v380_v5 = vadd.f32 %v374_v4, %v358_v62 }
 0x1a5   :  { %v382_v6 = vpop.permute.xlu0 %381 }
 0x1a6   :  { %v411_v10 = vadd.f32 1.4e-09, %v380_v5  ;;  %v384_v11 = vpop.permute.xlu1 %383 }
 0x1a7   :  { %v394_v12 = vsel %vm393_vm14, %v382_v6, %v384_v11 }
 0x1a8   :  { %461 = vrcp.f32 %v411_v10  ;;  %v400_v13 = vsub.f32 %v573_v1, %v394_v12 }
 0x1a9   :  { %v386_v14 = vpop.permute.xlu0 %385 }
 0x1aa   :  { %v403_v15 = vadd.f32 %v400_v13, %v378_v50  ;;  %v388_v16 = vpop.permute.xlu1 %387 }
 0x1ab   :  { %v395_v17 = vsel %vm393_vm14, %v386_v14, %v388_v16 }
 0x1ac   :  { %v406_v18 = vmul.f32 50.0, %v403_v15  ;;  %v401_v19 = vsub.f32 %v571_v0, %v395_v17 }
 0x1ad   :  { %v458_v20 = vpop.eup %457  ;;  %v390_v21 = vpop.permute.xlu0 %389 }
 0x1ae   :  { %v415_v22 = vmul.f32 %v458_v20, %v406_v18  ;;  %v404_v23 = vadd.f32 %v401_v19, %v379_v60  ;;  %v392_v24 = vpop.permute.xlu1 %391 }
 0x1af   :  { %v396_v7 = vsel %vm393_vm14, %v390_v21, %v392_v24 }
 0x1b0   :  { %418 = vst [vmem:[#allocation7] sm:$0xff] %v415_v22  ;;  %v407_v25 = vmul.f32 50.0, %v404_v23  ;;  %v402_v26 = vsub.f32 %v575_v2, %v396_v7 }
 0x1b1   :  { %v460_v1 = vpop.eup %459 }
 0x1b2   :  { %v416_v27 = vmul.f32 %v460_v1, %v407_v25  ;;  %v405_v28 = vadd.f32 %v402_v26, %v380_v5 }
 0x1b4   :  { %419 = vst [vmem:[#allocation7 + $0x8] sm:$0xff] %v416_v27  ;;  %v408_v29 = vmul.f32 50.0, %v405_v28 }
 0x1b5   :  { %v462_v30 = vpop.eup %461 }
 0x1b6   :  { %v417_v0 = vmul.f32 %v462_v30, %v408_v29 }
 0x1b8   :  { %420 = vst [vmem:[#allocation7 + $0x10] sm:$0xff] %v417_v0 }
 0x1b9   :  { %514 = shalt.err (!%p511_p0)
}
 0x1ba   :  { %432 = dma.vmem_to_hbm [thread:$0]  %s427_s6, 384, %s765_s2, [#allocation4], %s531_s18, %s531_s18, %s532_s19  }
 0x1bb   :  { %527 = dma.done.wait [#allocation4], 384  }
 0x1bc   :  { %528 = vsyncadd [#allocation4], 4294966912 }
 0x1bd   :  { %436 = vsyncpa [#allocation3], 1 }
 0x1be   :  { %437 = vsyncpa [#allocation6], 1 }
 0x1bf   :  { %438 = vsyncpa [#allocation4], 1 }

</bundles_post_ra>
